<compile_context>
chip_gen: v5e
topology: v5e:2x2
jax: 0.10.0
libtpu: 0.0.40
codegen_flags: <defaults>
</compile_context>

<pallas_src>
import functools

import jax
import jax.numpy as jnp
from jax.experimental import pallas as pl
from jax.experimental.pallas import tpu as pltpu


def _rmsnorm_kernel(x_ref, s_ref, o_ref, *, eps):
    # x_ref: (tm, dim), s_ref: (1, dim) pre-offset scale, o_ref: (tm, dim)
    # Pass 1: row mean-of-squares in f32.
    x32 = x_ref[...].astype(jnp.float32)
    ms = jnp.mean(x32 * x32, axis=-1, keepdims=True)
    inv = jax.lax.rsqrt(ms + eps)
    # Pass 2: re-read x from VMEM instead of keeping the full f32 upcast live
    # across the reduction — cheaper than spilling f32 vregs at large tiles.
    x_norm = (x_ref[...].astype(jnp.float32) * inv).astype(o_ref.dtype)
    # Multiply in the parameter dtype (promotion identical to the reference).
    o_ref[...] = (x_norm * s_ref[...]).astype(o_ref.dtype)


def _pick_tile_rows(rows, dim, itemsize, *, target_bytes=4 << 20):
    """Row tile: sublane-aligned, ~target_bytes per x block, >=2 grid steps."""
    sublane = max(8, 32 // itemsize)          # 8 for f32, 16 for bf16, 32 for int8
    tm = (target_bytes // max(dim * itemsize, 1)) // sublane * sublane
    tm = max(sublane, tm)
    # Never exceed the (sublane-rounded) row count.
    rows_up = -(-rows // sublane) * sublane
    tm = min(tm, rows_up)
    # Keep the grid at >= 2 steps when possible so the "parallel" axis can
    # shard across v7x's two TensorCores (1-TC chips are unaffected).
    half = (rows_up // 2) // sublane * sublane
    if half >= sublane:
        tm = min(tm, half)
    return max(sublane, tm)


def rmsnorm(x, weight, *, eps=1e-6, add_unit_offset=True):
    """RMSNorm over the last axis of `x` using a Pallas TPU kernel."""
    orig_shape = x.shape
    dim = orig_shape[-1]
    assert weight.shape == (dim,)

    # Flatten leading dims -> (rows, dim); glue only, hot path is in-kernel.
    rows = 1
    for s in orig_shape[:-1]:
        rows *= s
    x2d = x.reshape(rows, dim)

    # Hoist the unit offset out of the per-tile body; keep the parameter dtype.
    scale = (1.0 + weight).astype(weight.dtype) if add_unit_offset else weight
    scale2d = scale.reshape(1, dim)

    itemsize = jnp.dtype(x.dtype).itemsize
    tm = _pick_tile_rows(rows, dim, itemsize)
    grid = (pl.cdiv(rows, tm),)   # partial last block handled by Pallas masking

    kernel = functools.partial(_rmsnorm_kernel, eps=eps)

    # Mem-bound kernel: ~4 flops/elem (square, reduce-add, two output muls),
    # one rsqrt per row, read + write the slab once.
    cost = pl.CostEstimate(
        flops=4 * rows * dim,
        transcendentals=rows,
        bytes_accessed=2 * rows * dim * itemsize
        + dim * jnp.dtype(weight.dtype).itemsize,
    )

    out2d = pl.pallas_call(
        kernel,
        out_shape=jax.ShapeDtypeStruct((rows, dim), x.dtype),
        grid_spec=pltpu.PrefetchScalarGridSpec(
            num_scalar_prefetch=0,
            grid=grid,
            in_specs=[
                pl.BlockSpec((tm, dim), lambda i: (i, 0)),   # x tile
                pl.BlockSpec((1, dim), lambda i: (0, 0)),    # scale (broadcast)
            ],
            out_specs=pl.BlockSpec((tm, dim), lambda i: (i, 0)),
        ),
        compiler_params=pltpu.CompilerParams(
            dimension_semantics=("parallel",),
            # 2x in + 2x out double-buffered ~4 MiB blocks + f32 temporaries
            # stays well under this, which itself leaves ~16 MiB headroom on
            # v7x's 64 MiB physical VMEM (and plenty on 128 MiB v5e/v6e).
            vmem_limit_bytes=48 << 20,
        ),
        cost_estimate=cost,
    )(x2d, scale2d)

    return out2d.reshape(orig_shape)


def rmsnorm_ref(x, weight, *, eps=1e-6, add_unit_offset=True):
    """Pure-JAX reference mirroring the PyTorch forward."""
    x32 = x.astype(jnp.float32)
    xn = x32 * jax.lax.rsqrt(jnp.mean(x32 * x32, axis=-1, keepdims=True) + eps)
    xn = xn.astype(x.dtype)
    scale = (1.0 + weight) if add_unit_offset else weight
    return (xn * scale).astype(x.dtype)


if __name__ == "__main__":
    key = jax.random.PRNGKey(0)

    # Deterministic parameter init, exactly as the module: weight = zeros(dim).
    batch, seq, hidden = 2, 8, 128
    x = jax.random.normal(key, (batch, seq, hidden), dtype=jnp.float32)
    weight = jnp.zeros((hidden,), dtype=jnp.float32)

    out = rmsnorm(x, weight, eps=1e-6, add_unit_offset=True)
    out = jax.block_until_ready(out)
    ref = rmsnorm_ref(x, weight, eps=1e-6, add_unit_offset=True)
    assert out.shape == x.shape and out.dtype == x.dtype
    assert jnp.allclose(out, ref, atol=1e-5, rtol=1e-5)

    # Ragged row count (exercises the masked partial last block) with a
    # non-trivial weight.
    k1, k2 = jax.random.split(key)
    x2 = jax.random.normal(k1, (5, 7, 128), dtype=jnp.float32)
    w2 = 0.1 * jax.random.normal(k2, (128,), dtype=jnp.float32)
    out2 = jax.block_until_ready(rmsnorm(x2, w2))
    ref2 = rmsnorm_ref(x2, w2)
    assert jnp.allclose(out2, ref2, atol=1e-5, rtol=1e-5)

    print("KERNEL_OK")
</pallas_src>

<mosaic_0001>
module attributes {stable_mosaic.version = 11 : i64} {
  func.func @_rmsnorm_kernel(%arg0: i32, %arg1: memref<8x128xf32, #tpu.memory_space<vmem>>, %arg2: memref<1x128xf32, #tpu.memory_space<vmem>>, %arg3: memref<8x128xf32, #tpu.memory_space<vmem>>) attributes {dimension_semantics = [#tpu.dimension_semantics<parallel>], iteration_bounds = array<i64: 2>, scalar_prefetch = 0 : i64, scratch_operands = 0 : i64, tpu.core_type = #tpu.core_type<tc>, window_params = [{transform_indices = @transform_0, window_bounds = array<i64: 8, 128>}, {pipeline_mode = #tpu.pipeline_mode<synchronous>, transform_indices = @transform_1, window_bounds = array<i64: 1, 128>}, {transform_indices = @transform_2, window_bounds = array<i64: 8, 128>}]} {
    %c0 = arith.constant 0 : index
    %c0_0 = arith.constant 0 : index
    %0 = vector.load %arg1[%c0, %c0_0] : memref<8x128xf32, #tpu.memory_space<vmem>>, vector<8x128xf32>
    %1 = arith.mulf %0, %0 : vector<8x128xf32>
    %cst = arith.constant dense<0.000000e+00> : vector<8xf32>
    %2 = vector.multi_reduction <add>, %1, %cst [1] : vector<8x128xf32> to vector<8xf32>
    %3 = vector.shape_cast %2 : vector<8xf32> to vector<8x1xf32>
    %cst_1 = arith.constant 1.280000e+02 : f32
    %4 = vector.broadcast %cst_1 : f32 to vector<8x1xf32>
    %5 = arith.divf %3, %4 : vector<8x1xf32>
    %cst_2 = arith.constant 9.99999997E-7 : f32
    %6 = vector.broadcast %cst_2 : f32 to vector<8x1xf32>
    %7 = arith.addf %5, %6 : vector<8x1xf32>
    %8 = math.rsqrt %7 : vector<8x1xf32>
    %c0_3 = arith.constant 0 : index
    %c0_4 = arith.constant 0 : index
    %9 = vector.load %arg1[%c0_3, %c0_4] : memref<8x128xf32, #tpu.memory_space<vmem>>, vector<8x128xf32>
    %10 = vector.broadcast %8 : vector<8x1xf32> to vector<8x128xf32>
    %11 = arith.mulf %9, %10 : vector<8x128xf32>
    %c0_5 = arith.constant 0 : index
    %c0_6 = arith.constant 0 : index
    %12 = vector.load %arg2[%c0_5, %c0_6] : memref<1x128xf32, #tpu.memory_space<vmem>>, vector<1x128xf32>
    %13 = vector.broadcast %12 : vector<1x128xf32> to vector<8x128xf32>
    %14 = arith.mulf %11, %13 : vector<8x128xf32>
    %c0_7 = arith.constant 0 : index
    %c0_8 = arith.constant 0 : index
    %15 = vector.load %arg3[%c0_7, %c0_8] : memref<8x128xf32, #tpu.memory_space<vmem>>, vector<8x128xf32>
    tpu.vector_store %arg3[%c0_7, %c0_8], %14 {strides = array<i32>} : memref<8x128xf32, #tpu.memory_space<vmem>>, vector<8x128xf32>,
    return
  }
  func.func @transform_0(%arg0: i32) -> (i32, i32) {
    %c0_i32 = arith.constant 0 : i32
    %c0_i32_0 = arith.constant 0 : i32
    return %arg0, %c0_i32 : i32, i32
  }
  func.func @transform_1(%arg0: i32) -> (i32, i32) {
    %c0_i32 = arith.constant 0 : i32
    %c0_i32_0 = arith.constant 0 : i32
    %c0_i32_1 = arith.constant 0 : i32
    return %c0_i32, %c0_i32_0 : i32, i32
  }
  func.func @transform_2(%arg0: i32) -> (i32, i32) {
    %c0_i32 = arith.constant 0 : i32
    %c0_i32_0 = arith.constant 0 : i32
    return %arg0, %c0_i32 : i32, i32
  }
}

</mosaic_0001>

<bundles_post_ra>
// kernel: tpu_custom_call.1
= control target key start
LH: loop header
LB: loop body
LE: loop exit
PB: predicated region body
PF: predicated region fallthrough
CT: control target
= control target key end

     0   :  { %7 = vsyncpa [#allocation3], 0  ;;  %s670_s0 = inlined_call_operand.hbm [shape: f32[16,128], index: 0, kind: input, shape index: {}]   ;;  %s671_s1 = inlined_call_operand.hbm [shape: f32[1,128], index: 1, kind: input, shape index: {}]   ;;  %s672_s2 = inlined_call_operand.hbm [shape: f32[16,128], index: 2, kind: output, shape index: {}]  }
   0x1   :  { %9 = vsyncpa [#allocation3 + $0x1], 0 }
   0x2   :  { %10 = vsyncpa [#allocation6], 0 }
   0x3   :  { %11 = vsyncpa [#allocation4], 0 }
   0x4   :  { %13 = vsyncpa [#allocation4 + $0x1], 0  ;;  %s528_s9 = smov 0   ;;  %s530_s10 = smov 0  }
   0x5   :  { %s532_s11 = smov 0   ;;  %s534_s12 = smov 0  }
   0x6 LB: > { %s549_s13 = sadd.s32 4294967295, %s509_s12   ;;  %s302_s14 = sadd.s32 4294967294, %s509_s12   ;;  %s509_s12 = sphi %s534_s12, %s682_s12   ;;  %s505_s11 = sphi %s532_s11, %s681_s11   ;;  %s501_s10 = sphi %s530_s10, %s680_s10   ;;  %s497_s9 = sphi %s528_s9, %s679_s9  }
   0x7   : > { %p39_p0 = scmp.ne.s32.totalorder %s501_s10, %s497_s9  ;;  %p40_p1 = scmp.eq.s32.totalorder %s549_s13, 0 }
   0x8   : > { %p84_p2 = scmp.eq.s32.totalorder %s549_s13, 1  ;;  %p90_p3 = scmp.eq.s32.totalorder %s302_s14, 1 }
   0x9   : > { %p558_p4 = por %p40_p1, %p39_p0  ;;  %p303_p5 = scmp.ge.s32.totalorder %s509_s12, 1 }
   0xa   : > { %p563_p6 = por %p90_p3, %p39_p0  ;;  %p97_p7 = scmp.lt.s32.totalorder %s509_s12, 3 }
   0xb   : > { %s109_s19 = sshll.u32 %s671_s1, 4  ;;  %s511_s21 = smov [#allocation5]   ;;  %s110_s19 = int_to_ptr.hbm [resolvable:$true] %s109_s19 }
   0xc   : > { %p571_p8 = pnand %p303_p5, %p97_p7  ;;  %s111_s22 = sshll.u32 %s511_s21, 4  ;;  %s112_s22 = int_to_ptr.vmem [resolvable:$true] %s111_s22 }
   0xd   : > { %s581_s23 = sadd.s32 1, %s509_s12   ;;  %s26_s24 = sadd.s32 1, %s505_s11 }
   0xe   : > { %p324_p10 = pneg %p571_p8  ;;  %s23_s25 = ssub.s32 %s509_s12, %s581_s23 }
   0xf   : > { %p24_p12 = scmp.eq.s32.totalorder %s23_s25, 0  ;;  %p33_p13 = scmp.ne.s32.totalorder %s505_s11, %s501_s10 }
  0x10   : > { %p325_p11 = pnand %p324_p10, %p40_p1  ;;  %p34_p0 = scmp.eq.s32.totalorder %s509_s12, 0 }
  0x11   : > { %s590_s26 = scalar_select %p24_p12, %s505_s11, %s26_s24  }
  0x12   : > { %327 = dma.hbm_to_vmem [thread:$0]  (!%p325_p11), %s110_s19, 16, %s112_s22, [#allocation6]  }
  0x13   : > { %p594_p3 = por %p84_p2, %p33_p13  ;;  %p337_p5 = scmp.lt.s32.totalorder %s509_s12, 2 }
  0x14   : > { %s122_s28 = sand.u32 1, %s505_s11   ;;  %s307_s29 = sshll.u32 %s509_s12, 3 }
  0x15   : > { %p35_p7 = por %p34_p0, %p33_p13  ;;  %s306_s30 = sshll.u32 %s122_s28, 3 }
  0x16   : > { %s130_s5 = scalar_lea.hbm %s670_s0, %s307_s29  ;;  %s126_s7 = scalar_lea.vmem [#allocation2], %s306_s30 }
  0x17   : > { %s132_s6 = sshll.u32 %s130_s5, 4  ;;  %s134_s8 = sshll.u32 %s126_s7, 4  ;;  %s133_s6 = int_to_ptr.hbm [resolvable:$true] %s132_s6  ;;  %s135_s8 = int_to_ptr.vmem [resolvable:$true] %s134_s8 }
  0x18   : > { %p604_p10 = pnand %p337_p5, %p35_p7  ;;  %s123_s17 = scalar_lea.sflag [#allocation3], %s122_s28 }
  0x19   : > { %s409_s18 = sshra.s32 %s133_s6, 4  ;;  %s416_s24 = scalar_lea.hbm %s670_s0, 16  ;;  %s410_s18 = int_to_ptr.hbm [resolvable:$true] %s409_s18 }
  0x1a   : > { %s411_s19 = scalar_lea.hbm %s410_s18, 8  ;;  %p413_p11 = pneg %p604_p10 }
  0x1b   : > { %p412_p2 = scmp.ne.s32.totalorder %s410_s18, %s411_s19  ;;  %p417_p0 = scmp.lt.s32.totalorder %s410_s18, %s670_s0 }
  0x1c   : > { %p418_p5 = scmp.lt.s32.totalorder %s416_s24, %s411_s19 }
  0x1d   : > { %p414_p12 = pnand %p413_p11, %p412_p2 }
  0x1e   : > { %p419_p7 = por %p418_p5, %p417_p0 }
  0x1f   : > { %p415_p13 = pneg %p414_p12 }
  0x21   : > { %p420_p9 = pnand %p419_p7, %p415_p13 }
  0x23   : > { %423 = shalt.err (!%p420_p9)
}
  0x24   : > { %331 = dma.hbm_to_vmem [thread:$0]  (!%p604_p10), %s133_s6, 128, %s135_s8, %s123_s17  }
  0x25   : > { %143 = sbr.rel (%p571_p8) target bundleno = 193 (0xc1), region = 28  ;;  %s621_s28 = sand.u32 (!%p571_p8), 1, %s501_s10  }
  0x26   : > { %s309_s30 = sshll.u32 (!%p571_p8), %s621_s28, 3  ;;  %s146_s3 = scalar_lea.sflag (!%p571_p8), [#allocation3], %s621_s28 }
  0x27   : > { %s149_s4 = scalar_lea.vmem (!%p571_p8), [#allocation2], %s309_s30 }
  0x2a   : > { %484 = dma.done.wait (%p558_p4), %s146_s3, 128  }
  0x2b   : > { %486 = vsyncadd (%p558_p4), %s146_s3, 4294967168 }
  0x2c   : > { %488 = dma.done.wait (%p40_p1), [#allocation6], 16  }
  0x2d   : > { %490 = vsyncadd (%p40_p1), [#allocation6], 4294967280  ;;  %v176_v0 = vld [vmem:[%s149_s4] sm:$0xff]  ;;  %v512_v2 = vmov 128.0   ;;  %s313_s15 = sshll.u32 %s549_s13, 3  ;;  %s175_s7 = scalar_lea.vmem [#allocation7], %s309_s30 }
  0x2e   : > { %v177_v1 = vmul.f32 %v176_v0, %v176_v0  ;;  %375 = vrcp.f32 %v512_v2  ;;  %s217_s6 = scalar_lea.hbm %s672_s2, %s313_s15  ;;  %v374_v18 = vld [vmem:[#allocation5] ss:$0 sm:$0xff]  ;;  %s219_s8 = sshll.u32 %s175_s7, 4  ;;  %s220_s8 = int_to_ptr.vmem [resolvable:$true] %s219_s8 }
  0x2f   : > { %s221_s14 = sshll.u32 %s217_s6, 4  ;;  %s207_s13 = scalar_lea.sflag [#allocation4], %s621_s28  ;;  %s222_s14 = int_to_ptr.hbm [resolvable:$true] %s221_s14 }
  0x30   : > { %178 = vadd.xlane.f32.xlu0 %v177_v1  ;;  %s453_s17 = sshra.s32 %s222_s14, 4  ;;  %s459_s22 = scalar_lea.hbm %s672_s2, 16  ;;  %s454_s17 = int_to_ptr.hbm [resolvable:$true] %s453_s17 }
  0x31   : > { %s455_s18 = scalar_lea.hbm %s454_s17, 8  ;;  %p460_p9 = scmp.lt.s32.totalorder %s454_s17, %s672_s2 }
  0x32   : > { %p456_p1 = scmp.ne.s32.totalorder %s454_s17, %s455_s18  ;;  %p461_p10 = scmp.lt.s32.totalorder %s459_s22, %s455_s18 }
  0x34   : > { %v376_v3 = vpop.eup %375  ;;  %p457_p4 = pnand %p456_p1, %p594_p3  ;;  %p462_p2 = por %p461_p10, %p460_p9 }
  0x35   : > { %v181_v4 = vmul.f32 128.0, %v376_v3  ;;  %vm185_vm0 = vweird.f32 %v376_v3 }
  0x36   : > { %p458_p8 = pneg %p457_p4 }
  0x37   : > { %v182_v5 = vsub.f32 1.0, %v181_v4 }
  0x38   : > { %p463_p11 = pnand %p462_p2, %p458_p8 }
  0x39   : > { %v183_v6 = vmul.f32 %v376_v3, %v182_v5 }
  0x3b   : > { %v184_v7 = vadd.f32 %v376_v3, %v183_v6 }
  0x3d   : > { %v186_v8 = vsel %vm185_vm0, %v376_v3, %v184_v7 }
  0xa3   : > { %v179_v9 = vpop.xlane.xlu0 %178 }
  0xa4   : > { %v187_v10 = vmul.f32 %v186_v8, %v179_v9 }
  0xa6   : > { %v188_v11 = vadd.f32 1e-06, %v187_v10 }
  0xa8   : > { %377 = vrsqrt.f32 %v188_v11  ;;  %vm195_vm2 = vweird.f32 %v188_v11 }
  0xae   : > { %v378_v12 = vpop.eup %377 }
  0xaf   : > { %v190_v13 = vmul.f32 %v378_v12, %v188_v11  ;;  %vm196_vm1 = vweird.f32 %v378_v12 }
  0xb0   : > { %vm197_vm3 = vmor %vm195_vm2, %vm196_vm1 }
  0xb1   : > { %v191_v14 = vmul.f32 %v378_v12, %v190_v13 }
  0xb3   : > { %v192_v15 = vmul.f32 0.5, %v191_v14 }
  0xb5   : > { %v193_v16 = vsub.f32 1.5, %v192_v15 }
  0xb7   : > { %v194_v17 = vmul.f32 %v378_v12, %v193_v16 }
  0xb9   : > { %v198_v19 = vsel %vm197_vm3, %v378_v12, %v194_v17 }
  0xba   : > { %v199_v20 = vmul.f32 %v198_v19, %v176_v0 }
  0xbc   : > { %v204_v21 = vmul.f32 %v374_v18, %v199_v20 }
  0xbe   : > { %205 = vst [vmem:[%s175_s7] sm:$0xff] %v204_v21 }
  0xbf   : > { %466 = shalt.err (!%p463_p11)
}
  0xc0   : > { %322 = dma.vmem_to_hbm [thread:$0]  (%p594_p3), %s220_s8, 128, %s222_s14, %s207_s13  }
  0xc1 PF: > { %s233_s29 = sand.u32 1, %s497_s9   ;;  %p678_p12 = scmp.ge.s32.totalorder %s509_s12, 2 }
  0xc2   : > { %s234_s28 = scalar_lea.sflag [#allocation4], %s233_s29 }
  0xc3   : > { %p333_p13 = pnand %p678_p12, %p563_p6 }
  0xc5   : > { %p334_p0 = pneg %p333_p13 }
  0xc7   : > { %492 = dma.done.wait (%p334_p0), %s234_s28, 128  }
  0xc8   : > { %494 = vsyncadd (%p334_p0), %s234_s28, 4294967168  ;;  %p16_p5 = scmp.ge.s32.totalorder %s581_s23, 4   ;;  %s679_s9 = smov %s501_s10 }
  0xc9   : > { %s680_s10 = smov %s505_s11  ;;  %s681_s11 = smov %s590_s26 }
  0xca   : > { %s682_s12 = smov %s581_s23  ;;  %18 = sbr.rel (!%p16_p5) target bundleno = 6 (0x6), region = 77 }
  0xcf   :  { %240 = vsyncpa [#allocation3], 1 }
  0xd0   :  { %242 = vsyncpa [#allocation3 + $0x1], 1 }
  0xd1   :  { %243 = vsyncpa [#allocation6], 1 }
  0xd2   :  { %244 = vsyncpa [#allocation4], 1 }
  0xd3   :  { %246 = vsyncpa [#allocation4 + $0x1], 1 }

</bundles_post_ra>
